<compile_context>
chip_gen: v7x
topology: tpu7x:2x2x1
jax: 0.10.0
libtpu: 0.0.40
codegen_flags: <defaults>
</compile_context>

<pallas_src>
import jax
import jax.numpy as jnp
import numpy as np
from jax.experimental import pallas as pl
from jax.experimental.pallas import tpu as pltpu


def attn_readout_kernel(x_ref,                       # [Bt, N, D] raw feat (BN folded into weights)
                        xv_ref,                      # [Bt, D]    raw last-node rows (pre-gathered)
                        wu_ref, bu_ref,              # [D, H], [1, H]   fc_u with BN folded
                        wv_ref, bv_ref,              # [D, H], [1, H]   fc_v with BN folded (+ orig bias)
                        we_ref,                      # [1, H]           fc_e weight as a row
                        wout_ref, bout_ref,          # [D, O], [1, O]   fc_out with BN folded
                        o_ref):                      # [Bt, O]
    Bt, N, D = x_ref.shape
    H = wu_ref.shape[1]

    x = x_ref[...].astype(jnp.float32)               # [Bt, N, D]
    # feat_drop has p=0.0 -> identity.

    # fc_u over all Bt*N node rows in one MXU matmul (reshape is layout-free:
    # D stays on lanes, N=8-row groups stay on sublanes).
    x2 = x.reshape(Bt * N, D)
    u2 = jnp.dot(x2, wu_ref[...], preferred_element_type=jnp.float32) + bu_ref[...]   # [Bt*N, H]
    u = u2.reshape(Bt, N, H)

    # fc_v on the pre-gathered last-node rows (one well-shaped matmul per tile).
    v = jnp.dot(xv_ref[...].astype(jnp.float32), wv_ref[...],
                preferred_element_type=jnp.float32) + bv_ref[...]                     # [Bt, H]

    # e = fc_e(sigmoid(u + v)); output width is 1, so route it to VPU + XLU
    # (multiply + lane reduction) instead of a 1-column MXU matmul.
    s = jax.nn.sigmoid(u + v[:, None, :])                                             # [Bt, N, H]
    e = jnp.sum(s * we_ref[...], axis=-1, keepdims=True)                              # [Bt, N, 1]

    # Per-graph (segment) softmax over the node axis.
    m = jnp.max(e, axis=1, keepdims=True)
    p = jnp.exp(e - m)
    beta = p / jnp.sum(p, axis=1, keepdims=True)                                      # [Bt, N, 1]

    # segment_reduce(sum) of beta-weighted raw features.
    rst = jnp.sum(x * beta, axis=1)                                                   # [Bt, D]

    # fc_out with the BN affine folded in (valid since sum(beta) == 1 per graph).
    out = jnp.dot(rst, wout_ref[...], preferred_element_type=jnp.float32) + bout_ref[...]  # [Bt, O]
    o_ref[...] = out.astype(o_ref.dtype)


def _pick_bt(B, N, D, itemsize=4, max_rows=1024, tile_budget_bytes=8 << 20):
    """Largest divisor of B whose double-buffered feat tile fits the budget,
    preferring a choice that leaves >= 2 grid steps (megacore)."""
    divs = [bt for bt in range(1, B + 1)
            if B % bt == 0
            and bt * N <= max_rows
            and 2 * bt * N * D * itemsize <= tile_budget_bytes]
    if not divs:
        return 1
    multi = [bt for bt in divs if B // bt >= 2]
    return max(multi) if multi else max(divs)


def attn_readout(feat, last_nodes, params, *, eps=1e-5):
    """feat: [B, N, D] f32, last_nodes: [B] int32 (local node index per graph)."""
    B, N, D = feat.shape
    H = params["W_u"].shape[1]
    O = params["W_out"].shape[1]

    # --- BatchNorm1d (training-mode batch statistics over all B*N nodes) ----
    # Single fused pass over feat: mean and E[x^2] are independent reductions
    # XLA fuses into one read; var = E[x^2] - mean^2 (biased, like PyTorch).
    # TODO(synk): with inference-mode running stats this pass goes away entirely.
    flat = feat.reshape(B * N, D).astype(jnp.float32)
    mean = jnp.mean(flat, axis=0)
    m2 = jnp.mean(jnp.square(flat), axis=0)
    var = jnp.maximum(m2 - jnp.square(mean), 0.0)
    scale = params["bn_gamma"] * jax.lax.rsqrt(var + eps)   # [D]
    shift = params["bn_beta"] - mean * scale                # [D]

    # Fold the BN affine into the linear layers so the kernel reads raw feat:
    #   x_n = x*scale + shift
    #   fc_u(x_n)   = x @ (scale[:,None]*W_u)   + shift@W_u
    #   fc_v(x_n)   = x @ (scale[:,None]*W_v)   + (shift@W_v + b_v)
    #   fc_out(rst) = (sum_n beta*x) @ (scale[:,None]*W_out) + shift@W_out    (sum beta == 1)
    wu_f = scale[:, None] * params["W_u"]
    bu_f = (shift @ params["W_u"]).reshape(1, H)
    wv_f = scale[:, None] * params["W_v"]
    bv_f = (shift @ params["W_v"] + params["b_v"]).reshape(1, H)
    wout_f = scale[:, None] * params["W_out"]
    bout_f = (shift @ params["W_out"]).reshape(1, O)
    we_row = params["w_e"].reshape(1, H)

    # Pre-gather each graph's last-node row (raw feat; BN folded above).
    xv = feat[jnp.arange(B), last_nodes]                 # [B, D]

    # TODO(synk): on v6e/v7x, bf16 feat/weights at the MXU would halve HBM and
    # VMEM traffic; kept f32 here to preserve the rtol=1e-3/atol=1e-4 check.

    Bt = _pick_bt(B, N, D, itemsize=feat.dtype.itemsize)

    grid_spec = pltpu.PrefetchScalarGridSpec(
        num_scalar_prefetch=0,
        grid=(B // Bt,),
        in_specs=[
            pl.BlockSpec((Bt, N, D), lambda i: (i, 0, 0)),   # raw feat, Bt graphs / step
            pl.BlockSpec((Bt, D),    lambda i: (i, 0)),      # gathered last-node rows
            pl.BlockSpec((D, H),     lambda i: (0, 0)),      # W_u  (BN folded)
            pl.BlockSpec((1, H),     lambda i: (0, 0)),      # b_u  (BN folded)
            pl.BlockSpec((D, H),     lambda i: (0, 0)),      # W_v  (BN folded)
            pl.BlockSpec((1, H),     lambda i: (0, 0)),      # b_v  (BN folded + original bias)
            pl.BlockSpec((1, H),     lambda i: (0, 0)),      # w_e as a row
            pl.BlockSpec((D, O),     lambda i: (0, 0)),      # W_out (BN folded)
            pl.BlockSpec((1, O),     lambda i: (0, 0)),      # b_out (BN folded)
        ],
        out_specs=pl.BlockSpec((Bt, O), lambda i: (i, 0)),   # sublane-batched output slab
    )

    return pl.pallas_call(
        attn_readout_kernel,
        out_shape=jax.ShapeDtypeStruct((B, O), jnp.float32),
        grid_spec=grid_spec,
        compiler_params=pltpu.CompilerParams(
            dimension_semantics=("parallel",),
            vmem_limit_bytes=32 * 1024 * 1024,
        ),
    )(feat, xv, wu_f, bu_f, wv_f, bv_f, we_row, wout_f, bout_f)


def attn_readout_ref(feat, last_nodes, params):
    """Pure-JAX reference mirroring the PyTorch forward (training-mode BN)."""
    B, N, D = feat.shape
    eps = 1e-5
    flat = feat.reshape(B * N, D)
    mean = jnp.mean(flat, axis=0)
    var = jnp.mean(jnp.square(flat - mean), axis=0)      # biased variance (PyTorch norm)
    xn = ((flat - mean) / jnp.sqrt(var + eps)) * params["bn_gamma"] + params["bn_beta"]
    xn = xn.reshape(B, N, D)
    u = xn @ params["W_u"]                                               # [B, N, H]
    v = xn[jnp.arange(B), last_nodes] @ params["W_v"] + params["b_v"]    # [B, H]
    e = jax.nn.sigmoid(u + v[:, None, :]) @ params["w_e"]                # [B, N, 1]
    beta = jax.nn.softmax(e, axis=1)
    rst = jnp.sum(xn * beta, axis=1)                                     # [B, D]
    return rst @ params["W_out"]                                         # [B, O]


if __name__ == "__main__":
    # 16 graphs, 8 nodes each, input_dim=32, hidden=32, output=16.
    B, N, D, H, O = 16, 8, 32, 32, 16

    key = jax.random.PRNGKey(0)
    k_feat, k_last, k_wu, k_wv, k_bv, k_we, k_wo = jax.random.split(key, 7)

    feat = jax.random.normal(k_feat, (B, N, D), dtype=jnp.float32)
    last_nodes = jax.random.randint(k_last, (B,), 0, N, dtype=jnp.int32)  # local last-node index

    params = {
        "bn_gamma": jnp.ones((D,), jnp.float32),              # nn.BatchNorm1d default init
        "bn_beta": jnp.zeros((D,), jnp.float32),
        "W_u": 0.1 * jax.random.normal(k_wu, (D, H), dtype=jnp.float32),
        "W_v": 0.1 * jax.random.normal(k_wv, (D, H), dtype=jnp.float32),
        "b_v": 0.1 * jax.random.normal(k_bv, (H,), dtype=jnp.float32),
        "w_e": 0.1 * jax.random.normal(k_we, (H, 1), dtype=jnp.float32),
        "W_out": 0.1 * jax.random.normal(k_wo, (D, O), dtype=jnp.float32),
    }
    # TODO(synk): feat_drop (Dropout) with p=0.0 is the identity; nonzero p would need in-kernel PRNG.
    # TODO(synk): `activation` is None in this config; a nonlinearity would be one extra VPU op on [Bt, O].

    attn_fn = jax.jit(attn_readout)   # fuse stats / weight folding / gather around the pallas_call
    out = jax.block_until_ready(attn_fn(feat, last_nodes, params))
    ref = jax.block_until_ready(attn_readout_ref(feat, last_nodes, params))

    np.testing.assert_allclose(np.asarray(out), np.asarray(ref), rtol=1e-3, atol=1e-4)
    print("KERNEL_OK")
</pallas_src>

<mosaic_0001>
module attributes {stable_mosaic.version = 11 : i64} {
  func.func @attn_readout_kernel(%arg0: i32, %arg1: memref<8x8x32xf32, #tpu.memory_space<vmem>>, %arg2: memref<8x32xf32, #tpu.memory_space<vmem>>, %arg3: memref<32x32xf32, #tpu.memory_space<vmem>>, %arg4: memref<1x32xf32, #tpu.memory_space<vmem>>, %arg5: memref<32x32xf32, #tpu.memory_space<vmem>>, %arg6: memref<1x32xf32, #tpu.memory_space<vmem>>, %arg7: memref<1x32xf32, #tpu.memory_space<vmem>>, %arg8: memref<32x16xf32, #tpu.memory_space<vmem>>, %arg9: memref<1x16xf32, #tpu.memory_space<vmem>>, %arg10: memref<8x16xf32, #tpu.memory_space<vmem>>) attributes {dimension_semantics = [#tpu.dimension_semantics<parallel>], iteration_bounds = array<i64: 2>, scalar_prefetch = 0 : i64, scratch_operands = 0 : i64, tpu.core_type = #tpu.core_type<tc>, window_params = [{transform_indices = @transform_0, window_bounds = array<i64: 8, 8, 32>}, {transform_indices = @transform_1, window_bounds = array<i64: 8, 32>}, {pipeline_mode = #tpu.pipeline_mode<synchronous>, transform_indices = @transform_2, window_bounds = array<i64: 32, 32>}, {pipeline_mode = #tpu.pipeline_mode<synchronous>, transform_indices = @transform_3, window_bounds = array<i64: 1, 32>}, {pipeline_mode = #tpu.pipeline_mode<synchronous>, transform_indices = @transform_4, window_bounds = array<i64: 32, 32>}, {pipeline_mode = #tpu.pipeline_mode<synchronous>, transform_indices = @transform_5, window_bounds = array<i64: 1, 32>}, {pipeline_mode = #tpu.pipeline_mode<synchronous>, transform_indices = @transform_6, window_bounds = array<i64: 1, 32>}, {pipeline_mode = #tpu.pipeline_mode<synchronous>, transform_indices = @transform_7, window_bounds = array<i64: 32, 16>}, {pipeline_mode = #tpu.pipeline_mode<synchronous>, transform_indices = @transform_8, window_bounds = array<i64: 1, 16>}, {transform_indices = @transform_9, window_bounds = array<i64: 8, 16>}]} {
    %c0 = arith.constant 0 : index
    %c0_0 = arith.constant 0 : index
    %c0_1 = arith.constant 0 : index
    %0 = vector.load %arg1[%c0, %c0_0, %c0_1] : memref<8x8x32xf32, #tpu.memory_space<vmem>>, vector<8x8x32xf32>
    %1 = vector.shape_cast %0 : vector<8x8x32xf32> to vector<64x32xf32>
    %c0_2 = arith.constant 0 : index
    %c0_3 = arith.constant 0 : index
    %2 = vector.load %arg3[%c0_2, %c0_3] : memref<32x32xf32, #tpu.memory_space<vmem>>, vector<32x32xf32>
    %cst = arith.constant dense<0.000000e+00> : vector<64x32xf32>
    %3 = tpu.matmul %1, %2, %cst {dimension_numbers = #tpu.dot_dimension_numbers<[1], [0], [0], [1], [0, 0, 1, 1], [], []>} : vector<64x32xf32>, vector<32x32xf32>, vector<64x32xf32> -> vector<64x32xf32>
    %c0_4 = arith.constant 0 : index
    %c0_5 = arith.constant 0 : index
    %4 = vector.load %arg4[%c0_4, %c0_5] : memref<1x32xf32, #tpu.memory_space<vmem>>, vector<1x32xf32>
    %5 = vector.broadcast %4 : vector<1x32xf32> to vector<64x32xf32>
    %6 = arith.addf %3, %5 : vector<64x32xf32>
    %7 = vector.shape_cast %6 : vector<64x32xf32> to vector<8x8x32xf32>
    %c0_6 = arith.constant 0 : index
    %c0_7 = arith.constant 0 : index
    %8 = vector.load %arg2[%c0_6, %c0_7] : memref<8x32xf32, #tpu.memory_space<vmem>>, vector<8x32xf32>
    %c0_8 = arith.constant 0 : index
    %c0_9 = arith.constant 0 : index
    %9 = vector.load %arg5[%c0_8, %c0_9] : memref<32x32xf32, #tpu.memory_space<vmem>>, vector<32x32xf32>
    %cst_10 = arith.constant dense<0.000000e+00> : vector<8x32xf32>
    %10 = tpu.matmul %8, %9, %cst_10 {dimension_numbers = #tpu.dot_dimension_numbers<[1], [0], [0], [1], [0, 0, 1, 1], [], []>} : vector<8x32xf32>, vector<32x32xf32>, vector<8x32xf32> -> vector<8x32xf32>
    %c0_11 = arith.constant 0 : index
    %c0_12 = arith.constant 0 : index
    %11 = vector.load %arg6[%c0_11, %c0_12] : memref<1x32xf32, #tpu.memory_space<vmem>>, vector<1x32xf32>
    %12 = vector.broadcast %11 : vector<1x32xf32> to vector<8x32xf32>
    %13 = arith.addf %10, %12 : vector<8x32xf32>
    %14 = vector.shape_cast %13 : vector<8x32xf32> to vector<8x1x32xf32>
    %15 = vector.broadcast %14 : vector<8x1x32xf32> to vector<8x8x32xf32>
    %16 = arith.addf %7, %15 : vector<8x8x32xf32>
    %17 = arith.negf %16 : vector<8x8x32xf32>
    %18 = math.exp %17 : vector<8x8x32xf32>
    %cst_13 = arith.constant 1.000000e+00 : f32
    %19 = vector.broadcast %cst_13 : f32 to vector<8x8x32xf32>
    %20 = arith.addf %19, %18 : vector<8x8x32xf32>
    %21 = arith.divf %19, %20 : vector<8x8x32xf32>
    %c0_14 = arith.constant 0 : index
    %c0_15 = arith.constant 0 : index
    %22 = vector.load %arg7[%c0_14, %c0_15] : memref<1x32xf32, #tpu.memory_space<vmem>>, vector<1x32xf32>
    %23 = vector.shape_cast %22 : vector<1x32xf32> to vector<1x1x32xf32>
    %24 = vector.broadcast %23 : vector<1x1x32xf32> to vector<8x8x32xf32>
    %25 = arith.mulf %21, %24 : vector<8x8x32xf32>
    %cst_16 = arith.constant dense<0.000000e+00> : vector<8x8xf32>
    %26 = vector.multi_reduction <add>, %25, %cst_16 [2] : vector<8x8x32xf32> to vector<8x8xf32>
    %27 = vector.shape_cast %26 : vector<8x8xf32> to vector<8x8x1xf32>
    %cst_17 = arith.constant dense<0xFF800000> : vector<8x1xf32>
    %28 = vector.multi_reduction <maximumf>, %27, %cst_17 [1] : vector<8x8x1xf32> to vector<8x1xf32>
    %29 = vector.shape_cast %28 : vector<8x1xf32> to vector<8x1x1xf32>
    %30 = vector.broadcast %29 : vector<8x1x1xf32> to vector<8x8x1xf32>
    %31 = arith.subf %27, %30 : vector<8x8x1xf32>
    %32 = math.exp %31 : vector<8x8x1xf32>
    %cst_18 = arith.constant dense<0.000000e+00> : vector<8x1xf32>
    %33 = vector.multi_reduction <add>, %32, %cst_18 [1] : vector<8x8x1xf32> to vector<8x1xf32>
    %34 = vector.shape_cast %33 : vector<8x1xf32> to vector<8x1x1xf32>
    %35 = vector.broadcast %34 : vector<8x1x1xf32> to vector<8x8x1xf32>
    %36 = arith.divf %32, %35 : vector<8x8x1xf32>
    %37 = vector.broadcast %36 : vector<8x8x1xf32> to vector<8x8x32xf32>
    %38 = arith.mulf %0, %37 : vector<8x8x32xf32>
    %cst_19 = arith.constant dense<0.000000e+00> : vector<8x32xf32>
    %39 = vector.multi_reduction <add>, %38, %cst_19 [1] : vector<8x8x32xf32> to vector<8x32xf32>
    %c0_20 = arith.constant 0 : index
    %c0_21 = arith.constant 0 : index
    %40 = vector.load %arg8[%c0_20, %c0_21] : memref<32x16xf32, #tpu.memory_space<vmem>>, vector<32x16xf32>
    %cst_22 = arith.constant dense<0.000000e+00> : vector<8x16xf32>
    %41 = tpu.matmul %39, %40, %cst_22 {dimension_numbers = #tpu.dot_dimension_numbers<[1], [0], [0], [1], [0, 0, 1, 1], [], []>} : vector<8x32xf32>, vector<32x16xf32>, vector<8x16xf32> -> vector<8x16xf32>
    %c0_23 = arith.constant 0 : index
    %c0_24 = arith.constant 0 : index
    %42 = vector.load %arg9[%c0_23, %c0_24] : memref<1x16xf32, #tpu.memory_space<vmem>>, vector<1x16xf32>
    %43 = vector.broadcast %42 : vector<1x16xf32> to vector<8x16xf32>
    %44 = arith.addf %41, %43 : vector<8x16xf32>
    %c0_25 = arith.constant 0 : index
    %c0_26 = arith.constant 0 : index
    %45 = vector.load %arg10[%c0_25, %c0_26] : memref<8x16xf32, #tpu.memory_space<vmem>>, vector<8x16xf32>
    tpu.vector_store %arg10[%c0_25, %c0_26], %44 {strides = array<i32>} : memref<8x16xf32, #tpu.memory_space<vmem>>, vector<8x16xf32>,
    return
  }
  func.func @transform_0(%arg0: i32) -> (i32, i32, i32) {
    %c0_i32 = arith.constant 0 : i32
    %c0_i32_0 = arith.constant 0 : i32
    %c0_i32_1 = arith.constant 0 : i32
    return %arg0, %c0_i32, %c0_i32_0 : i32, i32, i32
  }
  func.func @transform_1(%arg0: i32) -> (i32, i32) {
    %c0_i32 = arith.constant 0 : i32
    %c0_i32_0 = arith.constant 0 : i32
    return %arg0, %c0_i32 : i32, i32
  }
  func.func @transform_2(%arg0: i32) -> (i32, i32) {
    %c0_i32 = arith.constant 0 : i32
    %c0_i32_0 = arith.constant 0 : i32
    %c0_i32_1 = arith.constant 0 : i32
    return %c0_i32, %c0_i32_0 : i32, i32
  }
  func.func @transform_3(%arg0: i32) -> (i32, i32) {
    %c0_i32 = arith.constant 0 : i32
    %c0_i32_0 = arith.constant 0 : i32
    %c0_i32_1 = arith.constant 0 : i32
    return %c0_i32, %c0_i32_0 : i32, i32
  }
  func.func @transform_4(%arg0: i32) -> (i32, i32) {
    %c0_i32 = arith.constant 0 : i32
    %c0_i32_0 = arith.constant 0 : i32
    %c0_i32_1 = arith.constant 0 : i32
    return %c0_i32, %c0_i32_0 : i32, i32
  }
  func.func @transform_5(%arg0: i32) -> (i32, i32) {
    %c0_i32 = arith.constant 0 : i32
    %c0_i32_0 = arith.constant 0 : i32
    %c0_i32_1 = arith.constant 0 : i32
    return %c0_i32, %c0_i32_0 : i32, i32
  }
  func.func @transform_6(%arg0: i32) -> (i32, i32) {
    %c0_i32 = arith.constant 0 : i32
    %c0_i32_0 = arith.constant 0 : i32
    %c0_i32_1 = arith.constant 0 : i32
    return %c0_i32, %c0_i32_0 : i32, i32
  }
  func.func @transform_7(%arg0: i32) -> (i32, i32) {
    %c0_i32 = arith.constant 0 : i32
    %c0_i32_0 = arith.constant 0 : i32
    %c0_i32_1 = arith.constant 0 : i32
    return %c0_i32, %c0_i32_0 : i32, i32
  }
  func.func @transform_8(%arg0: i32) -> (i32, i32) {
    %c0_i32 = arith.constant 0 : i32
    %c0_i32_0 = arith.constant 0 : i32
    %c0_i32_1 = arith.constant 0 : i32
    return %c0_i32, %c0_i32_0 : i32, i32
  }
  func.func @transform_9(%arg0: i32) -> (i32, i32) {
    %c0_i32 = arith.constant 0 : i32
    %c0_i32_0 = arith.constant 0 : i32
    return %arg0, %c0_i32 : i32, i32
  }
}

</mosaic_0001>

<bundles_post_ra>
// kernel: attn_readout.1
= control target key start
LH: loop header
LB: loop body
LE: loop exit
PB: predicated region body
PF: predicated region fallthrough
CT: control target
= control target key end

     0   :  { %14 = vsyncpa [#allocation3], 0  ;;  %s1763_s0 = inlined_call_operand.vmem [shape: f32[16,8,32], index: 0, kind: input, shape index: {}]   ;;  %s1764_s1 = inlined_call_operand.vmem [shape: f32[16,32], index: 1, kind: input, shape index: {}]   ;;  %s1765_s2 = inlined_call_operand.vmem [shape: f32[32,32], index: 2, kind: input, shape index: {}]   ;;  %s1766_s3 = inlined_call_operand.vmem [shape: f32[1,32], index: 3, kind: input, shape index: {}]   ;;  %s1767_s4 = inlined_call_operand.vmem [shape: f32[32,32], index: 4, kind: input, shape index: {}]   ;;  %s1768_s5 = inlined_call_operand.vmem [shape: f32[1,32], index: 5, kind: input, shape index: {}]   ;;  %s1769_s6 = inlined_call_operand.vmem [shape: f32[1,32], index: 6, kind: input, shape index: {}]   ;;  %s1770_s7 = inlined_call_operand.vmem [shape: f32[32,16], index: 7, kind: input, shape index: {}]   ;;  %s1771_s8 = inlined_call_operand.vmem [shape: f32[1,16], index: 8, kind: input, shape index: {}]   ;;  %s1772_s9 = inlined_call_operand.hbm [shape: f32[16,16], index: 9, kind: output, shape index: {}]  }
   0x1   :  { %16 = vsyncpa [#allocation3 + $0x1], 0  ;;  %s1505_s30 = smov 0   ;;  %s1507_s10 = smov 0  }
   0x2   :  { %s1509_s11 = smov 0   ;;  %s1511_s12 = smov 0  }
   0x3 LB: > { %s1526_s13 = sadd.s32 4294967295, %s1448_s12   ;;  %s1161_s14 = sadd.s32 4294967294, %s1448_s12   ;;  %s1448_s12 = sphi %s1511_s12, %s1778_s12   ;;  %s1444_s11 = sphi %s1509_s11, %s1777_s11   ;;  %s1440_s10 = sphi %s1507_s10, %s1776_s10   ;;  %s1436_s30 = sphi %s1505_s30, %s1775_s30  }
   0x4   : > { %s1530_s15 = sadd.s32 1, %s1448_s12   ;;  %s228_s16 = sadd.s32 1, %s1444_s11 }
   0x5   : > { %s225_s17 = ssub.s32 %s1448_s12, %s1530_s15  ;;  %p238_p0 = scmp.ne.s32.totalorder %s1444_s11, %s1440_s10 }
   0x6   : > { %p226_p1 = scmp.eq.s32.totalorder %s225_s17, 0  ;;  %p239_p2 = scmp.eq.s32.totalorder %s1526_s13, 1 }
   0x7   : > { %p244_p3 = scmp.ne.s32.totalorder %s1440_s10, %s1436_s30  ;;  %p245_p4 = scmp.eq.s32.totalorder %s1161_s14, 1 }
   0x8   : > { %s1541_s18 = scalar_select %p226_p1, %s1444_s11, %s228_s16  }
   0x9   : > { %p1543_p5 = por %p239_p2, %p238_p0  ;;  %p1547_p6 = por %p245_p4, %p244_p3 }
   0xa   : > { %p1164_p7 = scmp.ge.s32.totalorder %s1448_s12, 1  ;;  %p300_p8 = scmp.lt.s32.totalorder %s1448_s12, 3 }
   0xc   : > { %p301_p9 = pnand %p1164_p7, %p300_p8 }
   0xd   : > { %v358_v0 = vld [vmem:[%s1765_s2] sm:$0xff] (!%p301_p9)  ;;  %v359_v1 = vld [vmem:[%s1765_s2 + $0x8] sm:$0xff] (!%p301_p9)  ;;  %v1450_v3 = vmov (!%p301_p9), 0.0|0.0   ;;  %v360_v6 = vld [vmem:[%s1765_s2 + $0x10] sm:$0xff] (!%p301_p9)  ;;  %vm1451_vm0 = vmmov (!%p301_p9), 0   ;;  %v1452_v8 = vmov (!%p301_p9), 0.0   ;;  %v589_v25 = vlaneseq (!%p301_p9) }
   0xe   : > { %304 = sbr.rel (%p301_p9) target bundleno = 731 (0x2db), region = 56  ;;  %v500_v2 = vld [vmem:[%s1767_s4] sm:$0xff] (!%p301_p9)  ;;  %1267 = vmatprep.subr.bf16.mxu1 (!%p301_p9), %v1450_v3  ;;  %v1259_v4 = vpack.c.bf16 (!%p301_p9), %v359_v1, %v358_v0  ;;  %v501_v5 = vld [vmem:[%s1767_s4 + $0x8] sm:$0xff] (!%p301_p9)  ;;  %v361_v7 = vld [vmem:[%s1765_s2 + $0x18] sm:$0xff] (!%p301_p9)  ;;  %1245 = vmatprep.mubr.msk.f32.mxu1 (!%p301_p9), %vm1451_vm0, %v1452_v8  ;;  %s1166_s21 = sshll.u32 (!%p301_p9), %s1526_s13, 3  ;;  %vm369_vm1 = vcmask (!%p301_p9), 261120  }
   0xf   : > { %p346_p10 = scmp.lt.s32.totalorder (!%p301_p9), %s1526_s13, 1  ;;  %v1268_v9 = vpack.c.bf16 (!%p301_p9), %v501_v5, %v500_v2  ;;  %v1263_v10 = vpack.c.bf16 (!%p301_p9), %v361_v7, %v360_v6  ;;  %v502_v11 = vld [vmem:[%s1767_s4 + $0x10] sm:$0xff] (!%p301_p9)  ;;  %v503_v12 = vld [vmem:[%s1767_s4 + $0x18] sm:$0xff] (!%p301_p9)  ;;  %p341_p11 = scmp.lt.s32.totalorder (!%p301_p9), %s1166_s21, 15  ;;  %v1453_v23 = vmov (!%p301_p9), 1966171168  }
  0x10   : > { %1260 = vmatprep.subr.bf16.mxu0 (!%p301_p9), %v1259_v4  ;;  %v1271_v13 = vpack.c.bf16 (!%p301_p9), %v503_v12, %v502_v11  ;;  %v587_v24 = vunpack.c.l.s4 (!%p301_p9), %v1453_v23  ;;  %v590_v27 = vshrl.u32 (!%p301_p9), %v589_v25, 7  ;;  %v1178_v28 = vld [vmem:[%s1768_s5] ss:$0 sm:$0xff] (!%p301_p9)  ;;  %vm988_vm2 = vcmask (!%p301_p9), 1041409   ;;  %s337_s25 = sand.u32 (!%p301_p9), 1, %s1440_s10   ;;  %s1192_s29 = sshll.u32 (!%p301_p9), %s1526_s13, 7 }
  0x11   : > { %1269 = vmatpush3.bf16.msra.mxu1 (!%p301_p9), %v1268_v9  ;;  %1262 = vmatpush3.bf16.msra.mxu0 (!%p301_p9), %v1259_v4  ;;  %v1169_v38 = vld [vmem:[%s1766_s3] ss:$0 sm:$0xff] (!%p301_p9)  ;;  %vm990_vm3 = vcmask (!%p301_p9), 1042434   ;;  %vm992_vm4 = vcmask (!%p301_p9), 1043459   ;;  %vm994_vm5 = vcmask (!%p301_p9), 1044484   ;;  %vm996_vm6 = vcmask (!%p301_p9), 1045509  }
  0x12   : > { %1270 = vmatprep.subr.bf16.mxu1 (!%p301_p9), %v1450_v3  ;;  %1264 = vmatprep.subr.bf16.mxu0 (!%p301_p9), %v1263_v10  ;;  %v588_v26 = vunpack.c.0.s8 (!%p301_p9), %v587_v24  ;;  %v636_v37 = vsub.s32 (!%p301_p9), 0, %v590_v27  ;;  %vm998_vm7 = vcmask (!%p301_p9), 1046534   ;;  %vm1000_vm8 = vcmask (!%p301_p9), 1047559  }
  0x13   : > { %vm1074_vm9 = vcmask (!%p301_p9), 130048  }
  0x14   : > { %v591_v29 = vsub.s32 (!%p301_p9), %v588_v26, %v590_v27 }
  0x15   : > { %s347_s26 = scalar_select %p346_p10, %s1526_s13, 1  ;;  %1272 = vmatpush3.bf16.msra.mxu1 %v1271_v13  ;;  %1266 = vmatpush3.bf16.msra.mxu0 %v1263_v10 }
  0x16   : > { %s1780_s21 = smov (!%p341_p11, %s1166_s21), 15  ;;  %1273 = vmatprep.subr.bf16.mxu1 %v1450_v3  ;;  %s1454_s13 = smov [#allocation2]  }
  0x17   : > { %s1168_s27 = sshll.u32 %s347_s26, 3  ;;  %s1167_s28 = sshll.u32 %s1780_s21, 3 }
  0x18   : > { %s349_s16 = scalar_lea.vmem %s1764_s1, %s1168_s27  ;;  %s344_s23 = scalar_lea.vmem %s1763_s0, %s1167_s28 }
  0x19   : > { %v1589_v14 = vld [vmem:[%s344_s23] sm:$0xff]  ;;  %v1591_v16 = vld [vmem:[%s344_s23 + $0x8] sm:$0xff]  ;;  %v1595_v17 = vld [vmem:[%s344_s23 + $0x10] sm:$0xff]  ;;  %s1165_s26 = sshll.u32 %s337_s25, 3  ;;  %s1077_s21 = scalar_lea.sflag [#allocation3], %s337_s25 }
  0x1a   : > { %v499_v15 = vld [vmem:[%s349_s16] sm:$0xff]  ;;  %1225 = vmatprep.mubr.msk.f32.mxu0 %vm369_vm1, %v1589_v14  ;;  %v1603_v18 = vld [vmem:[%s344_s23 + $0x18] sm:$0xff]  ;;  %v1612_v20 = vld [vmem:[%s344_s23 + $0x28] sm:$0xff]  ;;  %s339_s14 = scalar_lea.vmem [#allocation2], %s1165_s26  ;;  %s1390_s26 = sshll.u32 %s1454_s13, 4  ;;  %s1391_s26 = int_to_ptr.vmem [resolvable:$false] %s1390_s26 }
  0x1b   : > { %1246 = vmatmul.mubr.msk.f32.vlgmr.msra.gmra.mrb[0].mxu1 %vm369_vm1, %v499_v15  ;;  %1226 = vmatmul.mubr.msk.f32.vlgmr.msra.gmra.mrb[0].mxu0 %vm369_vm1, %v1591_v16  ;;  %v1606_v19 = vld [vmem:[%s344_s23 + $0x20] sm:$0xff]  ;;  %v1614_v21 = vld [vmem:[%s344_s23 + $0x30] sm:$0xff]  ;;  %v1620_v22 = vld [vmem:[%s344_s23 + $0x38] sm:$0xff]  ;;  %s1090_s16 = sshll.u32 %s339_s14, 4  ;;  %s1721_s23 = scalar_lea.hbm %s1772_s9, %s1192_s29  ;;  %s1723_s16 = int_to_ptr.vmem [resolvable:$true] %s1090_s16 }
  0x1c   : > { %1228 = vmatprep.mubr.msk.f32.mxu0 %vm369_vm1, %v1595_v17  ;;  %1256 = vmatprep.mubr.msk.f32.mxu1 %vm1451_vm0, %v1452_v8  ;;  %s1386_s24 = scalar_lea.vmem %s1723_s16, 128  ;;  %s1392_s27 = scalar_lea.vmem %s1391_s26, 256 }
  0x1d   : > { %p1387_p12 = scmp.ne.s32.totalorder %s1723_s16, %s1386_s24  ;;  %p1393_p1 = scmp.lt.s32.totalorder %s1723_s16, %s1391_s26 }
  0x1e   : > { %p1394_p2 = scmp.lt.s32.totalorder %s1392_s27, %s1386_s24 }
  0x1f   : > { %1229 = vmatmul.mubr.msk.f32.gmra.mrb[2].mxu0 %vm369_vm1, %v1603_v18  ;;  %p1388_p13 = pnand %p1387_p12, %p1543_p5 }
  0x20   : > { %1231 = vmatprep.mubr.msk.f32.mxu0 %vm369_vm1, %v1606_v19  ;;  %p1395_p3 = por %p1394_p2, %p1393_p1 }
  0x21   : > { %p1389_p0 = pneg %p1388_p13 }
  0x23   : > { %1232 = vmatmul.mubr.msk.f32.gmra.mrb[4].mxu0 %vm369_vm1, %v1612_v20  ;;  %p1396_p4 = pnand %p1395_p3, %p1389_p0 }
  0x24   : > { %1234 = vmatprep.mubr.msk.f32.mxu0 %vm369_vm1, %v1614_v21 }
  0x27   : > { %1235 = vmatmul.mubr.msk.f32.gmra.mrb[6].mxu0 %vm369_vm1, %v1620_v22 }
  0xee   : > { %v580_v30 = vpop.f32.mrb[0].mxu1  ;;  %v1227_v31 = vpop.f32.mrb[0].mxu0 }
  0xef   : > { %v581_v32 = vadd.f32 %v1178_v28, %v580_v30  ;;  %v1247_v33 = vpop.f32.mrb[1].mxu1  ;;  %v460_v34 = vpop.f32.mrb[1].mxu0  ;;  %v466_v50 = vadd.f32 %v1227_v31, %v1169_v38 }
  0xf0   : > { %v461_v44 = vadd.f32 %v1169_v38, %v460_v34 }
  0xf1   : > { %v585_v35 = vcombine.high %v581_v32, %v581_v32  ;;  %v592_v36 = vrot.slane %v581_v32, %v591_v29 }
  0xf2   : > { %v1230_v39 = vpop.f32.mrb[2].mxu0 }
  0xf3   : > { %v599_v40 = vrot.slane %v585_v35, %v591_v29  ;;  %v600_v41 = vcombine.high %v592_v36, %v592_v36  ;;  %v608_v42 = vrot.slane %v592_v36, %v591_v29  ;;  %v470_v43 = vpop.f32.mrb[3].mxu0  ;;  %v476_v51 = vadd.f32 %v1230_v39, %v1169_v38 }
  0xf4   : > { %v471_v45 = vadd.f32 %v1169_v38, %v470_v43 }
  0xf5   : > { %v601_v46 = vcombine.high %v599_v40, %v599_v40  ;;  %v622_v47 = vrot.slane %v600_v41, %v591_v29  ;;  %v637_v48 = vrot.slane %v608_v42, %v636_v37  ;;  %v630_v49 = vcombine.high %v608_v42, %v608_v42 }
  0xf6   : > { %v1233_v52 = vpop.f32.mrb[4].mxu0  ;;  %v615_v53 = vrot.slane %v599_v40, %v591_v29 }
  0xf7   : > { %v641_v54 = vrot.slane %v622_v47, %v636_v37  ;;  %v674_v55 = vadd.f32 %v637_v48, %v461_v44  ;;  %v632_v56 = vcombine.high %v622_v47, %v622_v47  ;;  %v645_v57 = vrot.slane %v630_v49, %v636_v37  ;;  %v480_v58 = vpop.f32.mrb[5].mxu0  ;;  %v1188_v49 = vld [vmem:[%s1769_s6] ss:$0 sm:$0xff] }
  0xf8   : > { %v486_v59 = vadd.f32 %v1233_v52, %v1169_v38  ;;  %v629_v60 = vrot.slane %v601_v46, %v591_v29  ;;  %v481_v61 = vadd.f32 %v1169_v38, %v480_v58  ;;  %v653_v62 = vrot.slane %v615_v53, %v636_v37 }
  0xf9   : > { %v675_v63 = vadd.f32 %v641_v54, %v466_v50  ;;  %v1180_v0 = vmul.f32 -1.442695, %v674_v55  ;;  %v649_v1 = vrot.slane %v632_v56, %v636_v37  ;;  %v676_v2 = vadd.f32 %v645_v57, %v471_v45 }
  0xfa   : > { %v657_v4 = vrot.slane %v629_v60, %v636_v37  ;;  %v678_v5 = vadd.f32 %v653_v62, %v481_v61  ;;  %v1236_v6 = vpop.f32.mrb[6].mxu0  ;;  %v633_v7 = vcombine.high %v629_v60, %v629_v60  ;;  %v631_v8 = vcombine.high %v615_v53, %v615_v53 }
  0xfb   : > { %v1181_v9 = vmul.f32 -1.442695, %v675_v63  ;;  %1322 = vpow2.f32 %v1180_v0  ;;  %v677_v10 = vadd.f32 %v649_v1, %v476_v51  ;;  %v1182_v11 = vmul.f32 -1.442695, %v676_v2  ;;  %v490_v12 = vpop.f32.mrb[7].mxu0 }
  0xfc   : > { %v679_v13 = vadd.f32 %v657_v4, %v486_v59  ;;  %v1184_v15 = vmul.f32 -1.442695, %v678_v5  ;;  %v496_v23 = vadd.f32 %v1236_v6, %v1169_v38  ;;  %v665_v24 = vrot.slane %v633_v7, %v636_v37 }
  0xfd   : > { %1324 = vpow2.f32 %v1181_v9  ;;  %v1183_v25 = vmul.f32 -1.442695, %v677_v10  ;;  %v491_v26 = vadd.f32 %v1169_v38, %v490_v12  ;;  %v661_v27 = vrot.slane %v631_v8, %v636_v37  ;;  %v970_v12 = vld [vmem:[%s1770_s7 + $0x8] sm:$0xff] }
  0xfe   : > { %1326 = vpow2.f32 %v1182_v11  ;;  %v1185_v28 = vmul.f32 -1.442695, %v679_v13  ;;  %v681_v29 = vadd.f32 %v665_v24, %v496_v23  ;;  %v969_v11 = vld [vmem:[%s1770_s7] sm:$0xff]  ;;  %v971_v13 = vld [vmem:[%s1770_s7 + $0x10] sm:$0xff]  ;;  %v972_v23 = vld [vmem:[%s1770_s7 + $0x18] sm:$0xff] }
  0xff   : > { %1328 = vpow2.f32 %v1183_v25  ;;  %v680_v30 = vadd.f32 %v661_v27, %v491_v26  ;;  %v1277_v24 = vpack.c.bf16 %v972_v23, %v971_v13 }
 0x100   : > { %1330 = vpow2.f32 %v1185_v28  ;;  %v1187_v31 = vmul.f32 -1.442695, %v681_v29 }
 0x101   : > { %1332 = vpow2.f32 %v1184_v15  ;;  %v1186_v32 = vmul.f32 -1.442695, %v680_v30  ;;  %v1274_v15 = vpack.c.bf16 %v970_v12, %v969_v11 }
 0x102   : > { %1334 = vpow2.f32 %v1187_v31 }
 0x103   : > { %1336 = vpow2.f32 %v1186_v32  ;;  %1275 = vmatpush3.bf16.msra.mxu1 %v1274_v15 }
 0x104   : > { %1276 = vmatprep.subr.bf16.mxu1 %v1450_v3 }
 0x105   : > { %v1323_v33 = vpop.eup %1322 }
 0x106   : > { %v706_v34 = vadd.f32 1.0, %v1323_v33 }
 0x107   : > { %v1325_v35 = vpop.eup %1324  ;;  %1278 = vmatpush3.bf16.msra.mxu1 %v1277_v24 }
 0x108   : > { %v1327_v36 = vpop.eup %1326  ;;  %v707_v39 = vadd.f32 1.0, %v1325_v35  ;;  %1338 = vrcp.f32 %v706_v34 }
 0x109   : > { %v1329_v40 = vpop.eup %1328  ;;  %v708_v38 = vadd.f32 1.0, %v1327_v36 }
 0x10a   : > { %v1331_v37 = vpop.eup %1330  ;;  %1340 = vrcp.f32 %v707_v39  ;;  %v709_v41 = vadd.f32 1.0, %v1329_v40 }
 0x10b   : > { %v1333_v42 = vpop.eup %1332  ;;  %1342 = vrcp.f32 %v708_v38  ;;  %v711_v43 = vadd.f32 1.0, %v1331_v37 }
 0x10c   : > { %v1335_v44 = vpop.eup %1334  ;;  %1344 = vrcp.f32 %v709_v41  ;;  %v710_v45 = vadd.f32 1.0, %v1333_v42 }
 0x10d   : > { %v1337_v46 = vpop.eup %1336  ;;  %v713_v48 = vadd.f32 1.0, %v1335_v44 }
 0x10e   : > { %1346 = vrcp.f32 %v710_v45  ;;  %v712_v47 = vadd.f32 1.0, %v1337_v46 }
 0x10f   : > { %1348 = vrcp.f32 %v711_v43 }
 0x110   : > { %1350 = vrcp.f32 %v712_v47 }
 0x111   : > { %1352 = vrcp.f32 %v713_v48 }
 0x112   : > { %v1339_v50 = vpop.eup %1338 }
 0x113   : > { %v737_v51 = vmul.f32 %v1339_v50, %v1188_v49 }
 0x114   : > { %v1341_v52 = vpop.eup %1340 }
 0x115   : > { %v1343_v53 = vpop.eup %1342  ;;  %v745_v54 = vsel %vm369_vm1, %v737_v51, 0.0  ;;  %v738_v55 = vmul.f32 %v1341_v52, %v1188_v49 }
 0x116   : > { %v1345_v56 = vpop.eup %1344  ;;  %746 = vadd.xlane.f32.xlu0 %v745_v54  ;;  %v739_v57 = vmul.f32 %v1343_v53, %v1188_v49 }
 0x117   : > { %v740_v60 = vmul.f32 %v1345_v56, %v1188_v49  ;;  %v748_v62 = vsel %vm369_vm1, %v738_v55, 0.0 }
 0x118   : > { %v1347_v58 = vpop.eup %1346  ;;  %v751_v59 = vsel %vm369_vm1, %v739_v57, 0.0 }
 0x119   : > { %v1349_v61 = vpop.eup %1348  ;;  %752 = vadd.xlane.f32.xlu1 %v751_v59  ;;  %v741_v63 = vmul.f32 %v1347_v58, %v1188_v49  ;;  %v754_v1 = vsel %vm369_vm1, %v740_v60, 0.0 }
 0x11a   : > { %v1351_v0 = vpop.eup %1350  ;;  %749 = vadd.xlane.f32.xlu0 %v748_v62  ;;  %v742_v2 = vmul.f32 %v1349_v61, %v1188_v49 }
 0x11b   : > { %v1353_v4 = vpop.eup %1352  ;;  %v757_v5 = vsel %vm369_vm1, %v741_v63, 0.0  ;;  %v743_v6 = vmul.f32 %v1351_v0, %v1188_v49 }
 0x11c   : > { %v760_v7 = vsel %vm369_vm1, %v742_v2, 0.0  ;;  %v744_v8 = vmul.f32 %v1353_v4, %v1188_v49 }
 0x11d   : > { %755 = vadd.xlane.f32.xlu1 %v754_v1  ;;  %v763_v9 = vsel %vm369_vm1, %v743_v6, 0.0 }
 0x11e   : > { %758 = vadd.xlane.f32.xlu0 %v757_v5  ;;  %v766_v10 = vsel %vm369_vm1, %v744_v8, 0.0 }
 0x121   : > { %761 = vadd.xlane.f32.xlu1 %v760_v7 }
 0x122   : > { %764 = vadd.xlane.f32.xlu0 %v763_v9 }
 0x125   : > { %767 = vadd.xlane.f32.xlu1 %v766_v10 }
 0x1a3   : > { %v747_v25 = vpop.xlane.xlu0 %746 }
 0x1a4   : > { %v769_v26 = vrot.slane %v747_v25, 4 }
 0x1a6   : > { %v770_v27 = vmax.f32 %v747_v25, %v769_v26  ;;  %v753_v28 = vpop.xlane.xlu1 %752 }
 0x1a7   : > { %v781_v29 = vrot.slane %v753_v28, 4  ;;  %v750_v30 = vpop.xlane.xlu0 %749 }
 0x1a8   : > { %v771_v31 = vrot.slane %v770_v27, 2  ;;  %v775_v32 = vrot.slane %v750_v30, 4 }
 0x1a9   : > { %v782_v33 = vmax.f32 %v753_v28, %v781_v29 }
 0x1aa   : > { %v772_v34 = vmax.f32 %v770_v27, %v771_v31  ;;  %v776_v35 = vmax.f32 %v750_v30, %v775_v32  ;;  %v756_v36 = vpop.xlane.xlu1 %755 }
 0x1ab   : > { %v783_v39 = vrot.slane %v782_v33, 2  ;;  %v787_v40 = vrot.slane %v756_v36, 4  ;;  %v759_v38 = vpop.xlane.xlu0 %758 }
 0x1ac   : > { %v773_v37 = vrot.slane %v772_v34, 1  ;;  %v777_v41 = vrot.slane %v776_v35, 2  ;;  %v793_v42 = vrot.slane %v759_v38, 4 }
 0x1ad   : > { %v784_v3 = vmax.f32 %v782_v33, %v783_v39  ;;  %v788_v43 = vmax.f32 %v756_v36, %v787_v40 }
 0x1ae   : > { %v774_v44 = vmax.f32 %v772_v34, %v773_v37  ;;  %v778_v45 = vmax.f32 %v776_v35, %v777_v41  ;;  %v794_v46 = vmax.f32 %v759_v38, %v793_v42  ;;  %v762_v47 = vpop.xlane.xlu1 %761 }
 0x1af   : > { %v785_v48 = vrot.slane %v784_v3, 1  ;;  %v789_v49 = vrot.slane %v788_v43, 2  ;;  %v799_v50 = vrot.slane %v762_v47, 4  ;;  %v765_v51 = vpop.xlane.xlu0 %764 }
 0x1b0   : > { %v817_v52 = vsub.f32 %v747_v25, %v774_v44  ;;  %v779_v53 = vrot.slane %v778_v45, 1  ;;  %v795_v54 = vrot.slane %v794_v46, 2  ;;  %v805_v55 = vrot.slane %v765_v51, 4 }
 0x1b1   : > { %v786_v56 = vmax.f32 %v784_v3, %v785_v48  ;;  %v790_v57 = vmax.f32 %v788_v43, %v789_v49  ;;  %v800_v58 = vmax.f32 %v762_v47, %v799_v50 }
 0x1b2   : > { %v825_v59 = vmul.f32 1.442695, %v817_v52  ;;  %v780_v60 = vmax.f32 %v778_v45, %v779_v53  ;;  %v796_v61 = vmax.f32 %v794_v46, %v795_v54  ;;  %v806_v62 = vmax.f32 %v765_v51, %v805_v55  ;;  %v768_v63 = vpop.xlane.xlu1 %767 }
 0x1b3   : > { %v819_v0 = vsub.f32 %v753_v28, %v786_v56  ;;  %v791_v1 = vrot.slane %v790_v57, 1  ;;  %v801_v2 = vrot.slane %v800_v58, 2  ;;  %v811_v4 = vrot.slane %v768_v63, 4 }
 0x1b4   : > { %1354 = vpow2.f32 %v825_v59  ;;  %v818_v5 = vsub.f32 %v750_v30, %v780_v60  ;;  %v797_v6 = vrot.slane %v796_v61, 1  ;;  %v807_v7 = vrot.slane %v806_v62, 2 }
 0x1b5   : > { %v829_v8 = vmul.f32 1.442695, %v819_v0  ;;  %v792_v9 = vmax.f32 %v790_v57, %v791_v1  ;;  %v802_v10 = vmax.f32 %v800_v58, %v801_v2  ;;  %v812_v11 = vmax.f32 %v768_v63, %v811_v4 }
 0x1b6   : > { %v827_v12 = vmul.f32 1.442695, %v818_v5  ;;  %v798_v13 = vmax.f32 %v796_v61, %v797_v6  ;;  %v808_v15 = vmax.f32 %v806_v62, %v807_v7 }
 0x1b7   : > { %1356 = vpow2.f32 %v829_v8  ;;  %v820_v23 = vsub.f32 %v756_v36, %v792_v9  ;;  %v803_v24 = vrot.slane %v802_v10, 1  ;;  %v813_v25 = vrot.slane %v812_v11, 2 }
 0x1b8   : > { %1358 = vpow2.f32 %v827_v12  ;;  %v821_v26 = vsub.f32 %v759_v38, %v798_v13  ;;  %v809_v27 = vrot.slane %v808_v15, 1 }
 0x1b9   : > { %v831_v28 = vmul.f32 1.442695, %v820_v23  ;;  %v804_v29 = vmax.f32 %v802_v10, %v803_v24  ;;  %v814_v31 = vmax.f32 %v812_v11, %v813_v25 }
 0x1ba   : > { %v833_v30 = vmul.f32 1.442695, %v821_v26  ;;  %v810_v32 = vmax.f32 %v808_v15, %v809_v27 }
 0x1bb   : > { %1360 = vpow2.f32 %v831_v28  ;;  %v822_v33 = vsub.f32 %v762_v47, %v804_v29  ;;  %v815_v34 = vrot.slane %v814_v31, 1 }
 0x1bc   : > { %1362 = vpow2.f32 %v833_v30  ;;  %v823_v35 = vsub.f32 %v765_v51, %v810_v32 }
 0x1bd   : > { %v835_v39 = vmul.f32 1.442695, %v822_v33  ;;  %v816_v40 = vmax.f32 %v814_v31, %v815_v34 }
 0x1be   : > { %v1654_v37 = vpop.eup %1354  ;;  %v837_v36 = vmul.f32 1.442695, %v823_v35 }
 0x1bf   : > { %v841_v41 = vrot.slane %v1654_v37, 4  ;;  %1364 = vpow2.f32 %v835_v39  ;;  %v824_v38 = vsub.f32 %v768_v63, %v816_v40 }
 0x1c0   : > { %1366 = vpow2.f32 %v837_v36 }
 0x1c1   : > { %v1657_v42 = vpop.eup %1356  ;;  %v842_v3 = vadd.f32 %v1654_v37, %v841_v41  ;;  %v839_v43 = vmul.f32 1.442695, %v824_v38 }
 0x1c2   : > { %v1660_v44 = vpop.eup %1358  ;;  %v853_v45 = vrot.slane %v1657_v42, 4 }
 0x1c3   : > { %v843_v46 = vrot.slane %v842_v3, 2  ;;  %v847_v47 = vrot.slane %v1660_v44, 4  ;;  %1368 = vpow2.f32 %v839_v43 }
 0x1c4   : > { %v854_v48 = vadd.f32 %v1657_v42, %v853_v45 }
 0x1c5   : > { %v1665_v49 = vpop.eup %1360  ;;  %v844_v50 = vadd.f32 %v843_v46, %v842_v3  ;;  %v848_v51 = vadd.f32 %v1660_v44, %v847_v47 }
 0x1c6   : > { %v1668_v52 = vpop.eup %1362  ;;  %v855_v53 = vrot.slane %v854_v48, 2  ;;  %v859_v54 = vrot.slane %v1665_v49, 4 }
 0x1c7   : > { %v845_v55 = vrot.slane %v844_v50, 1  ;;  %v849_v56 = vrot.slane %v848_v51, 2  ;;  %v865_v57 = vrot.slane %v1668_v52, 4 }
 0x1c8   : > { %v856_v58 = vadd.f32 %v855_v53, %v854_v48  ;;  %v860_v59 = vadd.f32 %v1665_v49, %v859_v54 }
 0x1c9   : > { %v1673_v60 = vpop.eup %1364  ;;  %v846_v61 = vadd.f32 %v845_v55, %v844_v50  ;;  %v850_v62 = vadd.f32 %v849_v56, %v848_v51  ;;  %v866_v63 = vadd.f32 %v1668_v52, %v865_v57 }
 0x1ca   : > { %v1676_v0 = vpop.eup %1366  ;;  %v857_v1 = vrot.slane %v856_v58, 1  ;;  %v861_v2 = vrot.slane %v860_v59, 2  ;;  %v871_v4 = vrot.slane %v1673_v60, 4 }
 0x1cb   : > { %1370 = vrcp.f32 %v846_v61  ;;  %v851_v5 = vrot.slane %v850_v62, 1  ;;  %v867_v6 = vrot.slane %v866_v63, 2  ;;  %v877_v7 = vrot.slane %v1676_v0, 4 }
 0x1cc   : > { %v858_v8 = vadd.f32 %v857_v1, %v856_v58  ;;  %v862_v9 = vadd.f32 %v861_v2, %v860_v59  ;;  %v872_v10 = vadd.f32 %v1673_v60, %v871_v4 }
 0x1cd   : > { %v1681_v11 = vpop.eup %1368  ;;  %v852_v12 = vadd.f32 %v851_v5, %v850_v62  ;;  %v868_v13 = vadd.f32 %v867_v6, %v866_v63  ;;  %v878_v15 = vadd.f32 %v1676_v0, %v877_v7 }
 0x1ce   : > { %1372 = vrcp.f32 %v858_v8  ;;  %v863_v23 = vrot.slane %v862_v9, 1  ;;  %v873_v24 = vrot.slane %v872_v10, 2  ;;  %v883_v25 = vrot.slane %v1681_v11, 4 }
 0x1cf   : > { %1374 = vrcp.f32 %v852_v12  ;;  %v869_v26 = vrot.slane %v868_v13, 1  ;;  %v879_v27 = vrot.slane %v878_v15, 2 }
 0x1d0   : > { %v864_v28 = vadd.f32 %v863_v23, %v862_v9  ;;  %v874_v29 = vadd.f32 %v873_v24, %v872_v10  ;;  %v884_v31 = vadd.f32 %v1681_v11, %v883_v25 }
 0x1d1   : > { %v870_v30 = vadd.f32 %v869_v26, %v868_v13  ;;  %v880_v32 = vadd.f32 %v879_v27, %v878_v15 }
 0x1d2   : > { %1376 = vrcp.f32 %v864_v28  ;;  %v875_v33 = vrot.slane %v874_v29, 1  ;;  %v885_v34 = vrot.slane %v884_v31, 2 }
 0x1d3   : > { %1378 = vrcp.f32 %v870_v30  ;;  %v881_v35 = vrot.slane %v880_v32, 1 }
 0x1d4   : > { %v876_v39 = vadd.f32 %v875_v33, %v874_v29  ;;  %v886_v40 = vadd.f32 %v885_v34, %v884_v31 }
 0x1d5   : > { %v1371_v36 = vpop.eup %1370  ;;  %v882_v41 = vadd.f32 %v881_v35, %v880_v32 }
 0x1d6   : > { %v890_v38 = vmul.f32 %v1371_v36, %v1654_v37  ;;  %1380 = vrcp.f32 %v876_v39  ;;  %v887_v3 = vrot.slane %v886_v40, 1 }
 0x1d7   : > { %1382 = vrcp.f32 %v882_v41 }
 0x1d8   : > { %v1373_v43 = vpop.eup %1372  ;;  %v888_v45 = vadd.f32 %v887_v3, %v886_v40  ;;  %v905_v46 = vmul.f32 %v890_v38, %v1589_v14 }
 0x1d9   : > { %v1375_v47 = vpop.eup %1374  ;;  %v894_v48 = vmul.f32 %v1373_v43, %v1657_v42 }
 0x1da   : > { %v892_v50 = vmul.f32 %v1375_v47, %v1660_v44  ;;  %1384 = vrcp.f32 %v888_v45  ;;  %v913_v51 = vsel %vm369_vm1, %v905_v46, 0.0 }
 0x1db   : > { %v907_v53 = vmul.f32 %v894_v48, %v1595_v17  ;;  %v914_v54 = vrot.slane %v913_v51, 4 }
 0x1dc   : > { %v1377_v55 = vpop.eup %1376  ;;  %v906_v37 = vmul.f32 %v892_v50, %v1591_v16 }
 0x1dd   : > { %v1379_v56 = vpop.eup %1378  ;;  %v896_v57 = vmul.f32 %v1377_v55, %v1665_v49  ;;  %v915_v58 = vadd.f32 %v914_v54, %v913_v51  ;;  %v927_v14 = vsel %vm369_vm1, %v907_v53, 0.0 }
 0x1de   : > { %v898_v59 = vmul.f32 %v1379_v56, %v1668_v52  ;;  %v920_v42 = vsel %vm369_vm1, %v906_v37, 0.0  ;;  %v928_v44 = vrot.slane %v927_v14, 4 }
 0x1df   : > { %v908_v61 = vmul.f32 %v896_v57, %v1603_v18  ;;  %v916_v62 = vrot.slane %v915_v58, 2  ;;  %v921_v63 = vrot.slane %v920_v42, 4 }
 0x1e0   : > { %v1381_v17 = vpop.eup %1380  ;;  %v909_v1 = vmul.f32 %v898_v59, %v1606_v19  ;;  %v929_v2 = vadd.f32 %v928_v44, %v927_v14 }
 0x1e1   : > { %v1383_v16 = vpop.eup %1382  ;;  %v900_v4 = vmul.f32 %v1381_v17, %v1673_v60  ;;  %v917_v49 = vadd.f32 %v916_v62, %v915_v58  ;;  %v922_v5 = vadd.f32 %v921_v63, %v920_v42  ;;  %v934_v6 = vsel %vm369_vm1, %v908_v61, 0.0 }
 0x1e2   : > { %v902_v52 = vmul.f32 %v1383_v16, %v1676_v0  ;;  %v930_v7 = vrot.slane %v929_v2, 2  ;;  %v935_v8 = vrot.slane %v934_v6, 4  ;;  %v941_v9 = vsel %vm369_vm1, %v909_v1, 0.0  ;;  %v1189_v1 = vld [vmem:[%s1771_s8] ss:$0 sm:$0xff] }
 0x1e3   : > { %v910_v18 = vmul.f32 %v900_v4, %v1612_v20  ;;  %v923_v10 = vrot.slane %v922_v5, 2  ;;  %v942_v12 = vrot.slane %v941_v9, 4  ;;  %v918_v15 = vrot.slane %v917_v49, 1 }
 0x1e4   : > { %v1385_v13 = vpop.eup %1384  ;;  %v911_v19 = vmul.f32 %v902_v52, %v1614_v21  ;;  %v931_v23 = vadd.f32 %v930_v7, %v929_v2  ;;  %v936_v60 = vadd.f32 %v935_v8, %v934_v6 }
 0x1e5   : > { %v904_v24 = vmul.f32 %v1385_v13, %v1681_v11  ;;  %v924_v25 = vadd.f32 %v923_v10, %v922_v5  ;;  %v943_v26 = vadd.f32 %v942_v12, %v941_v9  ;;  %v948_v28 = vsel %vm369_vm1, %v910_v18, 0.0 }
 0x1e6   : > { %v932_v0 = vrot.slane %v931_v23, 1  ;;  %v937_v27 = vrot.slane %v936_v60, 2  ;;  %v955_v29 = vsel %vm369_vm1, %v911_v19, 0.0  ;;  %v949_v32 = vrot.slane %v948_v28, 4 }
 0x1e7   : > { %v912_v20 = vmul.f32 %v904_v24, %v1620_v22  ;;  %v925_v31 = vrot.slane %v924_v25, 1  ;;  %v944_v30 = vrot.slane %v943_v26, 2  ;;  %v919_v21 = vadd.f32 %v918_v15, %v917_v49 }
 0x1e8   : > { %v938_v33 = vadd.f32 %v937_v27, %v936_v60  ;;  %v956_v34 = vrot.slane %v955_v29, 4  ;;  %v950_v39 = vadd.f32 %v949_v32, %v948_v28  ;;  %v933_v36 = vadd.f32 %v932_v0, %v931_v23 }
 0x1e9   : > { %v926_v35 = vadd.f32 %v925_v31, %v924_v25  ;;  %v945_v11 = vadd.f32 %v944_v30, %v943_v26  ;;  %v962_v40 = vsel %vm369_vm1, %v912_v20, 0.0 }
 0x1ea   : > { %v939_v41 = vrot.slane %v938_v33, 1  ;;  %v957_v38 = vadd.f32 %v956_v34, %v955_v29  ;;  %v963_v3 = vrot.slane %v962_v40, 4  ;;  %v951_v45 = vrot.slane %v950_v39, 2 }
 0x1eb   : > { %v946_v43 = vrot.slane %v945_v11, 1  ;;  %v989_v22 = vsel %vm988_vm2, %v926_v35, %v919_v21 }
 0x1ec   : > { %v940_v46 = vadd.f32 %v939_v41, %v938_v33  ;;  %v958_v47 = vrot.slane %v957_v38, 2  ;;  %v964_v48 = vadd.f32 %v963_v3, %v962_v40  ;;  %v991_v50 = vsel %vm990_vm3, %v933_v36, %v989_v22 }
 0x1ed   : > { %v947_v51 = vadd.f32 %v946_v43, %v945_v11  ;;  %v952_v53 = vadd.f32 %v951_v45, %v950_v39 }
 0x1ee   : > { %v959_v54 = vadd.f32 %v958_v47, %v957_v38  ;;  %v965_v55 = vrot.slane %v964_v48, 2  ;;  %v993_v37 = vsel %vm992_vm4, %v940_v46, %v991_v50 }
 0x1ef   : > { %v953_v56 = vrot.slane %v952_v53, 1  ;;  %v995_v14 = vsel %vm994_vm5, %v947_v51, %v993_v37 }
 0x1f0   : > { %v960_v57 = vrot.slane %v959_v54, 1  ;;  %v966_v58 = vadd.f32 %v965_v55, %v964_v48 }
 0x1f1   : > { %v954_v59 = vadd.f32 %v953_v56, %v952_v53 }
 0x1f2   : > { %v961_v42 = vadd.f32 %v960_v57, %v959_v54  ;;  %v967_v44 = vrot.slane %v966_v58, 1 }
 0x1f3   : > { %v997_v61 = vsel %vm996_vm6, %v954_v59, %v995_v14 }
 0x1f4   : > { %v968_v62 = vadd.f32 %v967_v44, %v966_v58  ;;  %v999_v63 = vsel %vm998_vm7, %v961_v42, %v997_v61 }
 0x1f6   : > { %v1001_v17 = vsel %vm1000_vm8, %v968_v62, %v999_v63 }
 0x1f7   : > { %1257 = vmatmul.mubr.msk.f32.vlgmr.msra.gmra.mrb[2].mxu1 %vm369_vm1, %v1001_v17 }
 0x2ca   : > { %v1070_v2 = vpop.f32.mrb[2].mxu1 }
 0x2cb   : > { %v1071_v16 = vadd.f32 %v1189_v1, %v1070_v2  ;;  %v1258_v4 = vpop.f32.mrb[3].mxu1 }
 0x2cd   : > { %1075 = vst.msk [vmem:[%s339_s14] sm:$0xff] %vm1074_vm9, %v1071_v16 }
 0x2ce   : > { %1399 = shalt.err (!%p1396_p4)
}
 0x2cf   : > { %s1400_s25 = scalar_lea.hbm %s1721_s23, 128  ;;  %s1404_s14 = scalar_lea.hbm %s1772_s9, 256 }
 0x2d0   : > { %p1401_p7 = scmp.ne.s32.totalorder %s1721_s23, %s1400_s25  ;;  %p1405_p10 = scmp.lt.u32.totalorder %s1721_s23, %s1772_s9 }
 0x2d1   : > { %p1406_p11 = scmp.lt.u32.totalorder %s1404_s14, %s1400_s25  ;;  %p1408_p13 = scmp.lt.u32.totalorder %s1400_s25, %s1721_s23 }
 0x2d2   : > { %p1402_p8 = pnand %p1401_p7, %p1543_p5 }
 0x2d3   : > { %p1407_p12 = por %p1406_p11, %p1405_p10 }
 0x2d4   : > { %p1403_p9 = pneg %p1402_p8 }
 0x2d5   : > { %p1409_p0 = por %p1408_p13, %p1407_p12 }
 0x2d7   : > { %p1410_p1 = pnand %p1409_p0, %p1403_p9 }
 0x2d9   : > { %1413 = shalt.err (!%p1410_p1)
}
 0x2da   : > { %1279 = dma.vmem_to_hbm [thread:$0]  (%p1543_p5), %s1723_s16, 128, %s1721_s23, %s1077_s21  }
 0x2db PF: > { %p1285_p2 = scmp.ge.s32.totalorder %s1448_s12, 2  ;;  %s1102_s24 = sand.u32 1, %s1436_s30  }
 0x2dc   : > { %s1103_s13 = scalar_lea.sflag [#allocation3], %s1102_s24 }
 0x2dd   : > { %p1282_p3 = pnand %p1285_p2, %p1547_p6 }
 0x2df   : > { %1431 = dma.done.wait (!%p1282_p3), %s1103_s13, 128  }
 0x2e0   : > { %1433 = vsyncadd (!%p1282_p3), %s1103_s13, 4294967168  ;;  %p19_p4 = scmp.ge.s32.totalorder %s1530_s15, 4   ;;  %s1775_s30 = smov %s1440_s10 }
 0x2e1   : > { %s1776_s10 = smov %s1444_s11  ;;  %s1777_s11 = smov %s1541_s18 }
 0x2e2   : > { %s1778_s12 = smov %s1530_s15  ;;  %21 = sbr.rel (!%p19_p4) target bundleno = 3 (0x3), region = 94 }
 0x2e9   :  { %1108 = vsyncpa [#allocation3], 1 }
 0x2ea   :  { %1110 = vsyncpa [#allocation3 + $0x1], 1 }

</bundles_post_ra>
